<compile_context>
chip_gen: v6e
topology: v6e:2x2x1
jax: 0.10.0
libtpu: 0.0.40
codegen_flags: <defaults>
</compile_context>

<pallas_src>
import numpy as np
import jax
import jax.numpy as jnp
from jax import lax
from jax.experimental import pallas as pl
from jax.experimental.pallas import tpu as pltpu


# --------------------------------------------------------------------------
# Fused Pallas kernel: (1x1 conv -> center crop) ++ (3x3 valid conv), dim=1
# --------------------------------------------------------------------------
def _make_fused_kernel(tap_offsets, b_tile, c, cout_pad, m, mp):
    """Kernel factory.

    x_ref   : (b_tile, c, m)         compute dtype, row-flattened images
    w_ref   : (cout_pad, 9*c)        compute dtype, lane-dense fused weight
    o_ref   : (b_tile, cout_pad, m)  float32, lane-dense output
    xpad_ref: (b_tile, c, mp)        VMEM scratch, zero-tailed image copy
    """
    def kernel(x_ref, w_ref, o_ref, xpad_ref):
        # Zero-tailed VMEM copy of the images (replaces the old wrapper-side
        # jnp.pad which cost a full extra HBM read+write of the activations).
        # The tail is one 128-lane chunk per image -> ~KB of VPU stores.
        xpad_ref[:, :, m:] = jnp.zeros((b_tile, c, mp - m), dtype=xpad_ref.dtype)
        xpad_ref[:, :, :m] = x_ref[...]

        w = w_ref[...]                                         # (cout_pad, 9c)
        for b in range(b_tile):                                # static unroll
            # im2col: 9 statically shifted lane-slices stacked along the
            # K axis -> ONE K=9c matmul instead of nine K=c matmuls.
            cols = [xpad_ref[b, :, off:off + m] for off in tap_offsets]
            patches = jnp.concatenate(cols, axis=0)            # (9c, m)
            o_ref[b] = jnp.dot(
                w, patches, preferred_element_type=jnp.float32
            ).astype(o_ref.dtype)

    return kernel


def _build_fused_weight(w1x1, w3x3, cout_pad):
    """Lane-dense fused weight (cout_pad, 9*Cin); K order = tap-major.

    Column t*Cin + c (tap t = dh*3 + dw):
      * 3x3 branch rows: w3x3[o, c, dh, dw] at every tap.
      * 1x1 branch rows: w1x1[o, c] at the CENTER tap (t=4) only, which exactly
        reproduces the (H-(H-2))//2 == 1 center crop of that branch.
      * rows >= c0+c1 are zero (sublane padding; sliced off in the wrapper).
    """
    c0, cin = w1x1.shape
    c1, cin2, kh, kw = w3x3.shape
    assert cin == cin2 and kh == 3 and kw == 3
    wf = jnp.zeros((cout_pad, 9 * cin), dtype=jnp.float32)
    wf = wf.at[:c0, 4 * cin:5 * cin].set(w1x1.astype(jnp.float32))
    w3 = jnp.transpose(w3x3.astype(jnp.float32), (0, 2, 3, 1)).reshape(c1, 9 * cin)
    wf = wf.at[c0:c0 + c1, :].set(w3)
    return wf


def _choose_b_tile(n, per_image_bytes, budget_bytes):
    """Largest divisor of n that fits the VMEM budget and leaves >= 2 grid
    steps when n >= 2 (so both v7x TensorCores get work)."""
    cap = max(1, int(budget_bytes) // max(int(per_image_bytes), 1))
    if n >= 2:
        cap = min(cap, n // 2)
    cap = max(1, min(cap, n))
    for bt in range(cap, 0, -1):
        if n % bt == 0:
            return bt
    return 1


def fused_crop_concat_conv(x, w1x1, w3x3, *, compute_dtype=jnp.bfloat16,
                           vmem_budget_bytes=40 << 20):
    """Single pallas_call equivalent of
       concat([center_crop(conv1x1(x)), conv3x3_valid(x)], dim=1) in NCHW."""
    n, c, h, w = x.shape
    assert h >= 3 and w >= 3
    c0, c1 = w1x1.shape[0], w3x3.shape[0]
    cout = c0 + c1
    cout_pad = ((cout + 7) // 8) * 8            # full output sublane tiles
    ho, wo = h - 2, w - 2
    m = h * w                                   # lane-dense columns per image
    mp = m + ((2 * w + 2 + 127) // 128) * 128   # zero tail covers max tap offset

    tap_offsets = tuple(dh * w + dw for dh in range(3) for dw in range(3))
    w_fused = _build_fused_weight(w1x1, w3x3, cout_pad).astype(compute_dtype)
    x_flat = x.reshape(n, c, m).astype(compute_dtype)   # bf16: halves DMA bytes

    in_b = np.dtype(compute_dtype).itemsize
    # double-buffered x block + double-buffered f32 out block + xpad scratch
    per_img = 2 * c * m * in_b + 2 * cout_pad * m * 4 + c * mp * in_b
    b_tile = _choose_b_tile(n, per_img, vmem_budget_bytes)
    grid = (n // b_tile,)
    vmem_limit = int(min(48 << 20,
                         max(2 << 20, 2 * (b_tile * per_img + w_fused.size * in_b))))

    kernel = _make_fused_kernel(tap_offsets, b_tile, c, cout_pad, m, mp)
    out_flat = pl.pallas_call(
        kernel,
        out_shape=jax.ShapeDtypeStruct((n, cout_pad, m), jnp.float32),
        grid=grid,
        in_specs=[
            pl.BlockSpec((b_tile, c, m), lambda i: (i, 0, 0)),
            pl.BlockSpec((cout_pad, 9 * c), lambda i: (0, 0)),
        ],
        out_specs=pl.BlockSpec((b_tile, cout_pad, m), lambda i: (i, 0, 0)),
        scratch_shapes=[pltpu.VMEM((b_tile, c, mp), compute_dtype)],
        compiler_params=pltpu.CompilerParams(
            dimension_semantics=("parallel",),      # batch-parallel grid
            vmem_limit_bytes=vmem_limit,
        ),
    )(x_flat, w_fused)
    # TODO(synk): on v7x an explicit pltpu.CORE_PARALLEL / core_map split could
    # be used instead of relying on "parallel" megacore sharding.

    # Columns with h >= ho or w >= wo carry wrap garbage and channels >= cout
    # are zero padding; both are dropped by this single cheap wrapper slice.
    # TODO(synk): a consumer accepting the lane-dense (N, cout_pad, H*W) layout
    # could skip this extra HBM pass entirely.
    return out_flat.reshape(n, cout_pad, h, w)[:, :cout, :ho, :wo]


# --------------------------------------------------------------------------
# Branch modules (weight holders) + the Concat module
# --------------------------------------------------------------------------
class Conv1x1:
    """Pointwise conv (NCHW), bias-free. weight: (Cout, Cin)."""
    def __init__(self, weight):
        self.weight = weight

    def __call__(self, x):  # only used by the generic (non-fused) fallback
        return jnp.einsum("nchw,oc->nohw", x, self.weight)


class Conv3x3Valid:
    """3x3 conv, no padding (NCHW). weight: (Cout, Cin, 3, 3)."""
    def __init__(self, weight):
        self.weight = weight

    def __call__(self, x):  # only used by the generic (non-fused) fallback
        return lax.conv_general_dilated(
            x, self.weight, window_strides=(1, 1), padding="VALID",
            dimension_numbers=("NCHW", "OIHW", "NCHW"))


class ConcatPallas:
    """JAX/Pallas equivalent of the PyTorch Concat module."""

    def __init__(self, dim, *modules):
        self.dim = dim
        self.modules = list(modules)

    def __call__(self, x):
        # Fused fast path (exact): channel concat of [cropped 1x1, valid 3x3].
        if (self.dim == 1 and len(self.modules) == 2
                and isinstance(self.modules[0], Conv1x1)
                and isinstance(self.modules[1], Conv3x3Valid)):
            return fused_crop_concat_conv(
                x, self.modules[0].weight, self.modules[1].weight)
        # TODO(synk): generic Concat over arbitrary sub-modules falls back to
        # XLA ops (branches + wrapper-side crop/concat); only the pattern above
        # is fused into a Pallas kernel.
        outs = [mod(x) for mod in self.modules]
        th = min(int(o.shape[2]) for o in outs)
        tw = min(int(o.shape[3]) for o in outs)
        cropped = []
        for o in outs:
            d2 = (int(o.shape[2]) - th) // 2
            d3 = (int(o.shape[3]) - tw) // 2
            cropped.append(o[:, :, d2:d2 + th, d3:d3 + tw])
        return jnp.concatenate(cropped, axis=self.dim)

    def __len__(self):
        return len(self.modules)


# --------------------------------------------------------------------------
if __name__ == "__main__":
    key = jax.random.PRNGKey(0)
    kx, k0, k1 = jax.random.split(key, 3)

    N, C, H, W = 2, 4, 16, 16
    x = jax.random.normal(kx, (N, C, H, W), dtype=jnp.float32)

    # Deterministic synthetic weights for the two branches.
    w0 = 0.1 * jax.random.normal(k0, (6, C), dtype=jnp.float32)        # 1x1: 4->6
    w1 = 0.1 * jax.random.normal(k1, (5, C, 3, 3), dtype=jnp.float32)  # 3x3 valid: 4->5

    concat = ConcatPallas(1, Conv1x1(w0), Conv3x3Valid(w1))
    out = jax.block_until_ready(concat(x))                  # bf16 fast path

    # f32 kernel variant for a tight numerical check (bf16 operands relax tol).
    out_f32 = jax.block_until_ready(
        fused_crop_concat_conv(x, w0, w1, compute_dtype=jnp.float32))

    # Pure-JAX reference (same semantics as the PyTorch module).
    ref0 = jnp.einsum("nchw,oc->nohw", x, w0)
    ref1 = lax.conv_general_dilated(
        x, w1, window_strides=(1, 1), padding="VALID",
        dimension_numbers=("NCHW", "OIHW", "NCHW"))
    th, tw = ref1.shape[2], ref1.shape[3]
    d2 = (ref0.shape[2] - th) // 2
    d3 = (ref0.shape[3] - tw) // 2
    ref = jnp.concatenate(
        [ref0[:, :, d2:d2 + th, d3:d3 + tw], ref1], axis=1)

    assert out.shape == (N, 6 + 5, H - 2, W - 2), out.shape
    np.testing.assert_allclose(np.asarray(out_f32), np.asarray(ref),
                               rtol=1e-4, atol=1e-4)
    np.testing.assert_allclose(np.asarray(out), np.asarray(ref),
                               rtol=5e-2, atol=5e-2)

    print("KERNEL_OK")
</pallas_src>

<mosaic_0001>
module attributes {stable_mosaic.version = 11 : i64} {
  func.func @kernel(%arg0: i32, %arg1: memref<1x4x256xbf16, #tpu.memory_space<vmem>>, %arg2: memref<16x36xbf16, #tpu.memory_space<vmem>>, %arg3: memref<1x16x256xf32, #tpu.memory_space<vmem>>, %arg4: memref<1x4x384xbf16, #tpu.memory_space<vmem>>) attributes {dimension_semantics = [#tpu.dimension_semantics<parallel>], iteration_bounds = array<i64: 2>, scalar_prefetch = 0 : i64, scratch_operands = 1 : i64, tpu.core_type = #tpu.core_type<tc>, window_params = [{transform_indices = @transform_0, window_bounds = array<i64: 1, 4, 256>}, {pipeline_mode = #tpu.pipeline_mode<synchronous>, transform_indices = @transform_1, window_bounds = array<i64: 16, 36>}, {transform_indices = @transform_2, window_bounds = array<i64: 1, 16, 256>}]} {
    %cst = arith.constant 0.000000e+00 : bf16
    %0 = vector.broadcast %cst : bf16 to vector<1x4x128xbf16>
    %c0 = arith.constant 0 : index
    %c0_0 = arith.constant 0 : index
    %c256 = arith.constant 256 : index
    %1 = vector.load %arg4[%c0, %c0_0, %c256] : memref<1x4x384xbf16, #tpu.memory_space<vmem>>, vector<1x4x128xbf16>
    tpu.vector_store %arg4[%c0, %c0_0, %c256], %0 {strides = array<i32>} : memref<1x4x384xbf16, #tpu.memory_space<vmem>>, vector<1x4x128xbf16>,
    %c0_1 = arith.constant 0 : index
    %c0_2 = arith.constant 0 : index
    %c0_3 = arith.constant 0 : index
    %2 = vector.load %arg1[%c0_1, %c0_2, %c0_3] : memref<1x4x256xbf16, #tpu.memory_space<vmem>>, vector<1x4x256xbf16>
    %c0_4 = arith.constant 0 : index
    %c0_5 = arith.constant 0 : index
    %c0_6 = arith.constant 0 : index
    %3 = vector.load %arg4[%c0_4, %c0_5, %c0_6] : memref<1x4x384xbf16, #tpu.memory_space<vmem>>, vector<1x4x256xbf16>
    tpu.vector_store %arg4[%c0_4, %c0_5, %c0_6], %2 {strides = array<i32>} : memref<1x4x384xbf16, #tpu.memory_space<vmem>>, vector<1x4x256xbf16>,
    %c0_7 = arith.constant 0 : index
    %c0_8 = arith.constant 0 : index
    %4 = vector.load %arg2[%c0_7, %c0_8] : memref<16x36xbf16, #tpu.memory_space<vmem>>, vector<16x36xbf16>
    %c0_9 = arith.constant 0 : index
    %c0_10 = arith.constant 0 : index
    %c0_11 = arith.constant 0 : index
    %5 = vector.load %arg4[%c0_9, %c0_10, %c0_11] : memref<1x4x384xbf16, #tpu.memory_space<vmem>>, vector<1x4x256xbf16>
    %6 = vector.shape_cast %5 : vector<1x4x256xbf16> to vector<4x256xbf16>
    %c0_12 = arith.constant 0 : index
    %c0_13 = arith.constant 0 : index
    %c1 = arith.constant 1 : index
    %7 = vector.load %arg4[%c0_12, %c0_13, %c1] : memref<1x4x384xbf16, #tpu.memory_space<vmem>>, vector<1x4x256xbf16>
    %8 = vector.shape_cast %7 : vector<1x4x256xbf16> to vector<4x256xbf16>
    %c0_14 = arith.constant 0 : index
    %c0_15 = arith.constant 0 : index
    %c2 = arith.constant 2 : index
    %9 = vector.load %arg4[%c0_14, %c0_15, %c2] : memref<1x4x384xbf16, #tpu.memory_space<vmem>>, vector<1x4x256xbf16>
    %10 = vector.shape_cast %9 : vector<1x4x256xbf16> to vector<4x256xbf16>
    %c0_16 = arith.constant 0 : index
    %c0_17 = arith.constant 0 : index
    %c16 = arith.constant 16 : index
    %11 = vector.load %arg4[%c0_16, %c0_17, %c16] : memref<1x4x384xbf16, #tpu.memory_space<vmem>>, vector<1x4x256xbf16>
    %12 = vector.shape_cast %11 : vector<1x4x256xbf16> to vector<4x256xbf16>
    %c0_18 = arith.constant 0 : index
    %c0_19 = arith.constant 0 : index
    %c17 = arith.constant 17 : index
    %13 = vector.load %arg4[%c0_18, %c0_19, %c17] : memref<1x4x384xbf16, #tpu.memory_space<vmem>>, vector<1x4x256xbf16>
    %14 = vector.shape_cast %13 : vector<1x4x256xbf16> to vector<4x256xbf16>
    %c0_20 = arith.constant 0 : index
    %c0_21 = arith.constant 0 : index
    %c18 = arith.constant 18 : index
    %15 = vector.load %arg4[%c0_20, %c0_21, %c18] : memref<1x4x384xbf16, #tpu.memory_space<vmem>>, vector<1x4x256xbf16>
    %16 = vector.shape_cast %15 : vector<1x4x256xbf16> to vector<4x256xbf16>
    %c0_22 = arith.constant 0 : index
    %c0_23 = arith.constant 0 : index
    %c32 = arith.constant 32 : index
    %17 = vector.load %arg4[%c0_22, %c0_23, %c32] : memref<1x4x384xbf16, #tpu.memory_space<vmem>>, vector<1x4x256xbf16>
    %18 = vector.shape_cast %17 : vector<1x4x256xbf16> to vector<4x256xbf16>
    %c0_24 = arith.constant 0 : index
    %c0_25 = arith.constant 0 : index
    %c33 = arith.constant 33 : index
    %19 = vector.load %arg4[%c0_24, %c0_25, %c33] : memref<1x4x384xbf16, #tpu.memory_space<vmem>>, vector<1x4x256xbf16>
    %20 = vector.shape_cast %19 : vector<1x4x256xbf16> to vector<4x256xbf16>
    %c0_26 = arith.constant 0 : index
    %c0_27 = arith.constant 0 : index
    %c34 = arith.constant 34 : index
    %21 = vector.load %arg4[%c0_26, %c0_27, %c34] : memref<1x4x384xbf16, #tpu.memory_space<vmem>>, vector<1x4x256xbf16>
    %22 = vector.shape_cast %21 : vector<1x4x256xbf16> to vector<4x256xbf16>
    %23 = tpu.concatenate %6, %8, %10, %12, %14, %16, %18, %20, %22 in 0 : vector<4x256xbf16>, vector<4x256xbf16>, vector<4x256xbf16>, vector<4x256xbf16>, vector<4x256xbf16>, vector<4x256xbf16>, vector<4x256xbf16>, vector<4x256xbf16>, vector<4x256xbf16> -> vector<36x256xbf16>
    %cst_28 = arith.constant dense<0.000000e+00> : vector<16x256xf32>
    %24 = tpu.matmul %4, %23, %cst_28 {dimension_numbers = #tpu.dot_dimension_numbers<[1], [0], [0], [1], [0, 0, 1, 1], [], []>} : vector<16x36xbf16>, vector<36x256xbf16>, vector<16x256xf32> -> vector<16x256xf32>
    %c0_29 = arith.constant 0 : index
    %c0_30 = arith.constant 0 : index
    %c0_31 = arith.constant 0 : index
    %25 = vector.load %arg3[%c0_29, %c0_30, %c0_31] : memref<1x16x256xf32, #tpu.memory_space<vmem>>, vector<1x16x256xf32>
    %26 = vector.shape_cast %25 : vector<1x16x256xf32> to vector<16x256xf32>
    %27 = vector.shape_cast %24 : vector<16x256xf32> to vector<1x16x256xf32>
    tpu.vector_store %arg3[%c0_29, %c0_30, %c0_31], %27 {strides = array<i32>} : memref<1x16x256xf32, #tpu.memory_space<vmem>>, vector<1x16x256xf32>,
    return
  }
  func.func @transform_0(%arg0: i32) -> (i32, i32, i32) {
    %c0_i32 = arith.constant 0 : i32
    %c0_i32_0 = arith.constant 0 : i32
    %c0_i32_1 = arith.constant 0 : i32
    return %arg0, %c0_i32, %c0_i32_0 : i32, i32, i32
  }
  func.func @transform_1(%arg0: i32) -> (i32, i32) {
    %c0_i32 = arith.constant 0 : i32
    %c0_i32_0 = arith.constant 0 : i32
    %c0_i32_1 = arith.constant 0 : i32
    return %c0_i32, %c0_i32_0 : i32, i32
  }
  func.func @transform_2(%arg0: i32) -> (i32, i32, i32) {
    %c0_i32 = arith.constant 0 : i32
    %c0_i32_0 = arith.constant 0 : i32
    %c0_i32_1 = arith.constant 0 : i32
    return %arg0, %c0_i32, %c0_i32_0 : i32, i32, i32
  }
}

</mosaic_0001>

<bundles_post_ra>
// kernel: tpu_custom_call.1
= control target key start
LH: loop header
LB: loop body
LE: loop exit
PB: predicated region body
PF: predicated region fallthrough
CT: control target
= control target key end

     0   :  { %7 = vsyncpa [#allocation4], 0  ;;  %s924_s0 = inlined_call_operand.hbm [shape: bf16[2,4,256], index: 0, kind: input, shape index: {}]   ;;  %s925_s1 = inlined_call_operand.hbm [shape: bf16[16,36], index: 1, kind: input, shape index: {}]   ;;  %s926_s2 = inlined_call_operand.hbm [shape: f32[2,16,256], index: 2, kind: output, shape index: {}]  }
   0x1   :  { %9 = vsyncpa [#allocation4 + $0x1], 0 }
   0x2   :  { %10 = vsyncpa [#allocation7], 0 }
   0x3   :  { %11 = vsyncpa [#allocation5], 0 }
   0x4   :  { %13 = vsyncpa [#allocation5 + $0x1], 0  ;;  %s739_s9 = smov 0   ;;  %s741_s10 = smov 0  }
   0x5   :  { %s743_s11 = smov 0   ;;  %s745_s12 = smov 0  }
   0x6 LB: > { %s760_s13 = sadd.s32 4294967295, %s705_s12   ;;  %s487_s14 = sadd.s32 4294967294, %s705_s12   ;;  %s705_s12 = sphi %s745_s12, %s948_s12   ;;  %s701_s11 = sphi %s743_s11, %s947_s11   ;;  %s697_s10 = sphi %s741_s10, %s946_s10   ;;  %s693_s9 = sphi %s739_s9, %s945_s9  }
   0x7   : > { %p39_p0 = scmp.ne.s32.totalorder %s697_s10, %s693_s9  ;;  %p927_p1 = scmp.eq.s32.totalorder %s760_s13, 0 }
   0x8   : > { %p90_p3 = scmp.eq.s32.totalorder %s487_s14, 1  ;;  %p488_p5 = scmp.ge.s32.totalorder %s705_s12, 1 }
   0x9   : > { %p769_p4 = por %p927_p1, %p39_p0  ;;  %p97_p7 = scmp.lt.s32.totalorder %s705_s12, 3 }
   0xa   : > { %p774_p6 = por %p90_p3, %p39_p0  ;;  %s707_s18 = smov [#allocation6]  }
   0xb   : > { %s931_s15 = scalar_select %p769_p4, 1, 0 }
   0xc   : > { %s932_s16 = scalar_select %p774_p6, 1, 0 }
   0xd   : > { %p779_p8 = pnand %p488_p5, %p97_p7  ;;  %s109_s19 = sshll.u32 %s707_s18, 4  ;;  %s110_s19 = int_to_ptr.vmem [resolvable:$true] %s109_s19 }
   0xe   : > { %s793_s21 = sadd.s32 1, %s705_s12   ;;  %s26_s22 = sadd.s32 1, %s701_s11 }
   0xf   : > { %s933_s17 = scalar_select %p779_p8, 1, 0 }
  0x10   : > { %p517_p9 = pneg %p779_p8  ;;  %s23_s23 = ssub.s32 %s705_s12, %s793_s21 }
  0x11   : > { %s594_s24 = scalar_lea.vmem %s110_s19, 128  ;;  %p602_p5 = scmp.lt.s32.totalorder %s110_s19, %s110_s19 }
  0x12   : > { %p788_p11 = pnand %p517_p9, %p927_p1  ;;  %p595_p13 = scmp.ne.s32.totalorder %s110_s19, %s594_s24 }
  0x13   : > { %p603_p7 = scmp.lt.s32.totalorder %s594_s24, %s594_s24 }
  0x14   : > { %p585_p12 = pneg %p788_p11 }
  0x15   : > { %p604_p10 = por %p603_p7, %p602_p5 }
  0x16   : > { %p597_p0 = pnand %p595_p13, %p585_p12 }
  0x18   : > { %p598_p3 = pneg %p597_p0 }
  0x1a   : > { %p605_p2 = pnand %p604_p10, %p598_p3 }
  0x1c   : > { %608 = shalt.err (!%p605_p2)
}
  0x1d   : > { %s708_s25 = smov 64   ;;  %s709_s26 = smov 4  }
  0x1e   : > { %520 = dma.hbm_to_vmem [thread:$0]  (!%p788_p11), %s925_s1, 128, %s110_s19, [#allocation7], %s708_s25, %s708_s25, %s709_s26  }
  0x1f   : > { %p24_p9 = scmp.eq.s32.totalorder %s23_s23, 0  ;;  %p33_p12 = scmp.ne.s32.totalorder %s701_s11, %s697_s10 }
  0x20   : > { %p34_p10 = scmp.eq.s32.totalorder %s705_s12, 0  ;;  %p530_p2 = scmp.lt.s32.totalorder %s705_s12, 2 }
  0x21   : > { %s810_s29 = scalar_select %p24_p9, %s701_s11, %s26_s22  }
  0x22   : > { %p35_p13 = por %p34_p10, %p33_p12  ;;  %p935_p0 = scmp.eq.s32.totalorder %s760_s13, 1 }
  0x23   : > { %s123_s3 = sand.u32 1, %s701_s11   ;;  %s507_s4 = sshll.u32 %s705_s12, 6 }
  0x24   : > { %p814_p3 = por %p935_p0, %p33_p12  ;;  %s491_s5 = sshll.u32 %s123_s3, 2 }
  0x25   : > { %s823_s8 = scalar_lea.hbm %s924_s0, %s507_s4  ;;  %s127_s14 = scalar_lea.vmem [#allocation3], %s491_s5 }
  0x26   : > { %s936_s30 = scalar_select %p814_p3, 1, 0 }
  0x27   : > { %s135_s18 = sshll.u32 %s127_s14, 4  ;;  %p825_p11 = pnand %p530_p2, %p35_p13  ;;  %s136_s18 = int_to_ptr.vmem [resolvable:$true] %s135_s18 }
  0x28   : > { %s124_s20 = scalar_lea.sflag [#allocation4], %s123_s3  ;;  %s609_s22 = scalar_lea.hbm %s823_s8, 64 }
  0x29   : > { %p610_p5 = scmp.ne.s32.totalorder %s823_s8, %s609_s22  ;;  %p611_p7 = pneg %p825_p11 }
  0x2a   : > { %s614_s25 = scalar_lea.hbm %s924_s0, 128  ;;  %p615_p10 = scmp.lt.s32.totalorder %s823_s8, %s924_s0 }
  0x2b   : > { %p612_p9 = pnand %p611_p7, %p610_p5  ;;  %p616_p2 = scmp.lt.s32.totalorder %s614_s25, %s609_s22 }
  0x2d   : > { %p613_p12 = pneg %p612_p9  ;;  %p617_p13 = por %p616_p2, %p615_p10 }
  0x2f   : > { %p618_p0 = pnand %p617_p13, %p613_p12 }
  0x31   : > { %621 = shalt.err (!%p618_p0)
}
  0x32   : > { %s622_s28 = scalar_lea.vmem %s136_s18, 64  ;;  %s710_s3 = smov [#allocation3]  }
  0x33   : > { %p623_p1 = scmp.ne.s32.totalorder %s136_s18, %s622_s28  ;;  %s627_s4 = sshll.u32 %s710_s3, 4  ;;  %s628_s4 = int_to_ptr.vmem [resolvable:$false] %s627_s4 }
  0x34   : > { %s629_s5 = scalar_lea.vmem %s628_s4, 128  ;;  %p630_p5 = scmp.lt.s32.totalorder %s136_s18, %s628_s4 }
  0x35   : > { %p625_p6 = pnand %p623_p1, %p611_p7  ;;  %p631_p9 = scmp.lt.s32.totalorder %s629_s5, %s622_s28 }
  0x37   : > { %p626_p3 = pneg %p625_p6  ;;  %p632_p4 = por %p631_p9, %p630_p5 }
  0x39   : > { %p633_p8 = pnand %p632_p4, %p626_p3 }
  0x3b   : > { %636 = shalt.err (!%p633_p8)
}
  0x3c   : > { %524 = dma.hbm_to_vmem [thread:$0]  (!%p825_p11), %s823_s8, 64, %s136_s18, %s124_s20  }
  0x3d   : > { %p938_p12 = scmp.ne.s32.totalorder %s933_s17, 0 }
  0x3e   : > { %s846_s6 = sand.u32 (!%p938_p12), 1, %s697_s10   ;;  %p939_p1 = scmp.ne.s32.totalorder (!%p938_p12), %s931_s15, 0 }
  0x3f   : > { %144 = sbr.rel (%p938_p12) target bundleno = 462 (0x1ce), region = 28  ;;  %s495_s7 = sshll.u32 (!%p938_p12), %s846_s6, 2 }
  0x40   : > { %s147_s14 = scalar_lea.sflag (!%p938_p12), [#allocation4], %s846_s6  ;;  %s150_s22 = scalar_lea.vmem (!%p938_p12), [#allocation3], %s495_s7 }
  0x44   : > { %680 = dma.done.wait (%p939_p1), %s147_s14, 64  }
  0x45   : > { %682 = vsyncadd (%p939_p1), %s147_s14, 4294967232  ;;  %p940_p4 = scmp.eq.s32.totalorder %s760_s13, 0 }
  0x47   : > { %684 = dma.done.wait (%p940_p4), [#allocation7], 128   ;;  %p941_p6 = pmov %p940_p4 }
  0x48   : > { %v711_v0 = vmov 0   ;;  %v712_v1 = vmov 1983009808   ;;  %v197_v3 = vlaneseq  ;;  %v177_v4 = vld [vmem:[%s150_s22] sm:$0xf]  ;;  %s713_s15 = smov 111  }
  0x49   : > { %686 = vsyncadd (%p941_p6), [#allocation7], 4294967168  ;;  %176 = vst [vmem:[#allocation2 + $0x4] sm:$0x3] %v711_v0  ;;  %375 = vmatprep.mubr.bf16.mxu0 %v711_v0  ;;  %v195_v2 = vunpack.c.l.s4 %v712_v1  ;;  %s714_s17 = smov 94   ;;  %s715_s8 = smov 96  }
  0x4a   : > { %178 = vst [vmem:[#allocation2] sm:$0xf] %v177_v4  ;;  %v198_v6 = vshrl.u32 %v197_v3, 7  ;;  %s716_s18 = smov 110   ;;  %s717_s19 = smov 95   ;;  %vm290_vm0 = vcmask 769024  }
  0x4b   : > { %v196_v5 = vunpack.c.0.s8 %v195_v2  ;;  %s718_s20 = smov 127   ;;  %s719_s23 = smov 126   ;;  %vm293_vm1 = vcmask 1041408   ;;  %vm254_vm2 = vcmask 908288   ;;  %vm263_vm3 = vcmask 900096  }
  0x4c   : > { %s720_s24 = smov 112   ;;  %vm272_vm4 = vcmask 785408   ;;  %vm281_vm5 = vcmask 777216   ;;  %vm300_vm6 = vcmask 1043456   ;;  %vm305_vm7 = vcmask 1045504   ;;  %s497_s25 = sshll.u32 %s846_s6, 5 }
  0x4d   : > { %v199_v7 = vsub.s32 %v196_v5, %v198_v6  ;;  %vm215_vm8 = vcmask 1039360   ;;  %vm234_vm9 = vcmask 1031168   ;;  %vm244_vm10 = vcmask 916480   ;;  %s174_s26 = scalar_lea.vmem [#allocation8], %s497_s25  ;;  %s508_s28 = sshll.u32 %s760_s13, 9 }
  0x4e   : > { %vm333_vm11 = vcmask 293888   ;;  %s404_s27 = sshll.u32 %s174_s26, 4  ;;  %s881_s5 = scalar_lea.hbm %s926_s2, %s508_s28  ;;  %s876_s27 = int_to_ptr.vmem [resolvable:$true] %s404_s27 }
  0x4f   : > { %s391_s7 = scalar_lea.sflag [#allocation5], %s846_s6  ;;  %s637_s14 = scalar_lea.vmem %s876_s27, 512 }
  0x50   : > { %p638_p8 = scmp.ne.s32.totalorder %s876_s27, %s637_s14  ;;  %p942_p3 = scmp.ne.s32.totalorder %s936_s30, 0 }
  0x51   : > { %v182_v8 = vld [vmem:[#allocation2] sm:$0x3f]  ;;  %s721_s13 = smov [#allocation8]  }
  0x52   : > { %v207_v9 = vrot.slane %v182_v8, %v199_v7  ;;  %v218_v10 = vcombine.high %v182_v8, %v182_v8  ;;  %v193_v13 = vcombine.low %v182_v8, %v182_v8  ;;  %v498_v56 = vld.sshfl [vmem:[#allocation2] sm:$0x33 pattern:$0x76325410]  ;;  %p639_p11 = pnand %p638_p8, %p942_p3  ;;  %s641_s22 = sshll.u32 %s721_s13, 4  ;;  %s642_s22 = int_to_ptr.vmem [resolvable:$false] %s641_s22 }
  0x53   : > { %v191_v57 = vcombine.high %v498_v56, %v498_v56  ;;  %p644_p10 = scmp.lt.s32.totalorder %s876_s27, %s642_s22 }
  0x54   : > { %248 = vrot.lane.b32.xlu1 %v207_v9, %s713_s15  ;;  %284 = vrot.lane.b32.xlu0 %v207_v9, %s714_s17  ;;  %v225_v11 = vrot.slane %v218_v10, %v199_v7  ;;  %v247_v12 = vcombine.high %v207_v9, %v207_v9  ;;  %v226_v14 = vcombine.low %v207_v9, %v207_v9  ;;  %v582_v10 = vld [vmem:[#allocation6] sm:$0xff]   ;;  %p640_p7 = pneg %p639_p11 }
  0x55   : > { %v200_v15 = vrot.slane %v193_v13, %v199_v7 }
  0x56   : > { %v227_v16 = vcombine.low %v225_v11, %v225_v11 }
  0x57   : > { %v208_v17 = vcombine.high %v200_v15, %v200_v15  ;;  %v237_v18 = vcombine.low %v200_v15, %v200_v15 }
  0x58   : > { %268 = vrot.lane.b32.xlu1 %v207_v9, %s715_s8  ;;  %261 = vrot.lane.b32.xlu0 %v207_v9, %s716_s18 }
  0x5c   : > { %288 = vrot.lane.b32.xlu1 %v225_v11, %s714_s17  ;;  %286 = vrot.lane.b32.xlu0 %v247_v12, %s714_s17 }
  0x60   : > { %250 = vrot.lane.b32.xlu1 %v247_v12, %s713_s15  ;;  %252 = vrot.lane.b32.xlu0 %v225_v11, %s713_s15  ;;  %s643_s15 = scalar_lea.vmem %s642_s22, 1024 }
  0x61   : > { %p645_p2 = scmp.lt.s32.totalorder %s643_s15, %s637_s14 }
  0x63   : > { %p646_p13 = por %p645_p2, %p644_p10 }
  0x64   : > { %266 = vrot.lane.b32.xlu1 %v226_v14, %s715_s8  ;;  %257 = vrot.lane.b32.xlu0 %v200_v15, %s716_s18 }
  0x65   : > { %p647_p0 = pnand %p646_p13, %p640_p7 }
  0x68   : > { %270 = vrot.lane.b32.xlu0 %v227_v16, %s715_s8  ;;  %259 = vrot.lane.b32.xlu1 %v208_v17, %s716_s18 }
  0x6c   : > { %277 = vrot.lane.b32.xlu0 %v200_v15, %s717_s19  ;;  %279 = vrot.lane.b32.xlu1 %v226_v14, %s717_s19 }
  0x70   : > { %275 = vrot.lane.b32.xlu0 %v237_v18, %s717_s19  ;;  %211 = vrot.lane.b32.xlu1 %v208_v17, %s718_s20 }
  0x74   : > { %213 = vrot.lane.b32.xlu0 %v207_v9, %s718_s20  ;;  %209 = vrot.lane.b32.xlu1 %v200_v15, %s718_s20 }
  0x78   : > { %230 = vrot.lane.b32.xlu0 %v207_v9, %s719_s23  ;;  %232 = vrot.lane.b32.xlu1 %v227_v16, %s719_s23 }
  0x7c   : > { %228 = vrot.lane.b32.xlu0 %v226_v14, %s719_s23  ;;  %240 = vrot.lane.b32.xlu1 %v200_v15, %s720_s24 }
  0x80   : > { %242 = vrot.lane.b32.xlu0 %v226_v14, %s720_s24  ;;  %238 = vrot.lane.b32.xlu1 %v237_v18, %s720_s24 }
  0xc6   : > { %v249_v19 = vpop.permute.xlu1 %248  ;;  %v285_v20 = vpop.permute.xlu0 %284 }
  0xca   : > { %v269_v21 = vpop.permute.xlu1 %268  ;;  %v262_v22 = vpop.permute.xlu0 %261 }
  0xce   : > { %v289_v23 = vpop.permute.xlu1 %288  ;;  %v287_v24 = vpop.permute.xlu0 %286 }
  0xcf   : > { %v292_v25 = vsel %vm290_vm0, %v287_v24, %v289_v23  ;;  %v291_v26 = vsel %vm290_vm0, %v285_v20, %v287_v24 }
  0xd0   : > { %500 = vmatprep.subr.msk.bf16.mxu0 %vm293_vm1, %v292_v25  ;;  %v338_v27 = vsel %vm293_vm1, %v291_v26, 0 }
  0xd1   : > { %354 = vmatpush1.bf16.msra.mxu0 %v338_v27 }
  0xd2   : > { %v251_v28 = vpop.permute.xlu1 %250  ;;  %v253_v29 = vpop.permute.xlu0 %252 }
  0xd3   : > { %v256_v34 = vsel %vm254_vm2, %v251_v28, %v253_v29  ;;  %v255_v41 = vsel %vm254_vm2, %v249_v19, %v251_v28 }
  0xd6   : > { %v267_v30 = vpop.permute.xlu1 %266  ;;  %v258_v31 = vpop.permute.xlu0 %257 }
  0xd7   : > { %v273_v46 = vsel %vm272_vm4, %v267_v30, %v269_v21 }
  0xda   : > { %v271_v32 = vpop.permute.xlu0 %270  ;;  %v260_v33 = vpop.permute.xlu1 %259 }
  0xdb   : > { %v265_v35 = vsel %vm263_vm3, %v260_v33, %v262_v22  ;;  %v274_v36 = vsel %vm272_vm4, %v269_v21, %v271_v32  ;;  %v264_v38 = vsel %vm263_vm3, %v258_v31, %v260_v33 }
  0xdc   : > { %v317_v37 = vsel %vm293_vm1, %v256_v34, %v265_v35  ;;  %v314_v44 = vsel %vm293_vm1, %v255_v41, %v264_v38 }
  0xdd   : > { %v321_v43 = vsel %vm300_vm6, %v317_v37, %v274_v36  ;;  %v319_v50 = vsel %vm300_vm6, %v314_v44, %v273_v46 }
  0xde   : > { %v278_v39 = vpop.permute.xlu0 %277  ;;  %v280_v40 = vpop.permute.xlu1 %279 }
  0xdf   : > { %v283_v42 = vsel %vm281_vm5, %v278_v39, %v280_v40 }
  0xe0   : > { %v326_v45 = vsel %vm305_vm7, %v321_v43, %v283_v42 }
  0xe1   : > { %355 = vmatprep.subr.bf16.mxu0 %v326_v45 }
  0xe2   : > { %v276_v47 = vpop.permute.xlu0 %275  ;;  %v212_v48 = vpop.permute.xlu1 %211 }
  0xe3   : > { %v282_v49 = vsel %vm281_vm5, %v276_v47, %v278_v39 }
  0xe4   : > { %v323_v51 = vsel %vm305_vm7, %v319_v50, %v282_v49 }
  0xe5   : > { %356 = vmatpush1.bf16.msra.mxu0 %v323_v51 }
  0xe6   : > { %v214_v52 = vpop.permute.xlu0 %213  ;;  %v210_v53 = vpop.permute.xlu1 %209 }
  0xe7   : > { %v217_v60 = vsel %vm215_vm8, %v212_v48, %v214_v52  ;;  %v216_v61 = vsel %vm215_vm8, %v210_v53, %v212_v48 }
  0xe8   : > { %v299_v0 = vsel %vm293_vm1, %v191_v57, %v217_v60  ;;  %v296_v1 = vsel %vm293_vm1, %v498_v56, %v216_v61 }
  0xea   : > { %v231_v54 = vpop.permute.xlu0 %230  ;;  %v233_v55 = vpop.permute.xlu1 %232 }
  0xeb   : > { %v236_v62 = vsel %vm234_vm9, %v231_v54, %v233_v55 }
  0xec   : > { %v304_v6 = vsel %vm300_vm6, %v299_v0, %v236_v62 }
  0xee   : > { %v229_v58 = vpop.permute.xlu0 %228  ;;  %v241_v59 = vpop.permute.xlu1 %240 }
  0xef   : > { %v235_v63 = vsel %vm234_vm9, %v229_v58, %v231_v54 }
  0xf0   : > { %v302_v7 = vsel %vm300_vm6, %v296_v1, %v235_v63 }
  0xf2   : > { %v243_v2 = vpop.permute.xlu0 %242  ;;  %v239_v3 = vpop.permute.xlu1 %238 }
  0xf3   : > { %v246_v4 = vsel %vm244_vm10, %v241_v59, %v243_v2  ;;  %v245_v5 = vsel %vm244_vm10, %v239_v3, %v241_v59 }
  0xf4   : > { %v310_v8 = vsel %vm305_vm7, %v304_v6, %v246_v4  ;;  %v307_v9 = vsel %vm305_vm7, %v302_v7, %v245_v5 }
  0xf5   : > { %357 = vmatprep.subr.bf16.mxu0 %v310_v8 }
  0xf6   : > { %358 = vmatpush1.bf16.msra.mxu0 %v307_v9 }
  0xf9   : > { %501 = vmatmul.mubr.msk.bf16.vlgmr.msra.gmra.mxu0 %vm333_vm11, %v582_v10 }
 0x1b9   : > { %v377_v11 = vpop.f32.mrf.mxu0 }
 0x1ba   : > { %386 = vst [vmem:[%s174_s26] sm:$0xff] %v377_v11 }
 0x1bb   : > { %v379_v12 = vpop.f32.mrf.mxu0 }
 0x1bc   : > { %387 = vst [vmem:[%s174_s26 + $0x8] sm:$0xff] %v379_v12 }
 0x1bd   : > { %v381_v13 = vpop.f32.mrf.mxu0 }
 0x1be   : > { %388 = vst [vmem:[%s174_s26 + $0x10] sm:$0xff] %v381_v13 }
 0x1bf   : > { %v383_v14 = vpop.f32.mrf.mxu0 }
 0x1c0   : > { %389 = vst [vmem:[%s174_s26 + $0x18] sm:$0xff] %v383_v14 }
 0x1c1   : > { %650 = shalt.err (!%p647_p0)
}
 0x1c2   : > { %s651_s17 = scalar_lea.hbm %s881_s5, 512  ;;  %s655_s19 = scalar_lea.hbm %s926_s2, 1024 }
 0x1c3   : > { %p652_p5 = scmp.ne.s32.totalorder %s881_s5, %s651_s17  ;;  %p656_p1 = scmp.lt.s32.totalorder %s881_s5, %s926_s2 }
 0x1c4   : > { %p657_p4 = scmp.lt.s32.totalorder %s655_s19, %s651_s17 }
 0x1c5   : > { %p653_p9 = pnand %p652_p5, %p942_p3 }
 0x1c6   : > { %p658_p6 = por %p657_p4, %p656_p1 }
 0x1c7   : > { %p654_p12 = pneg %p653_p9 }
 0x1c9   : > { %p659_p8 = pnand %p658_p6, %p654_p12 }
 0x1cb   : > { %662 = shalt.err (!%p659_p8)
}
 0x1cc   : > { %s722_s24 = smov 256   ;;  %s723_s25 = smov 16  }
 0x1cd   : > { %515 = dma.vmem_to_hbm [thread:$0]  (%p942_p3), %s876_s27, 512, %s881_s5, %s391_s7, %s722_s24, %s722_s24, %s723_s25  }
 0x1ce PF: > { %s419_s26 = sand.u32 1, %s693_s9   ;;  %p943_p11 = scmp.ne.s32.totalorder %s932_s16, 0 }
 0x1cf   : > { %p944_p7 = scmp.ge.s32.totalorder %s705_s12, 2  ;;  %s420_s28 = scalar_lea.sflag [#allocation5], %s419_s26 }
 0x1d1   : > { %p526_p10 = pnand %p944_p7, %p943_p11 }
 0x1d3   : > { %p527_p2 = pneg %p526_p10 }
 0x1d5   : > { %688 = dma.done.wait (%p527_p2), %s420_s28, 512  }
 0x1d6   : > { %690 = vsyncadd (%p527_p2), %s420_s28, 4294966784  ;;  %p16_p13 = scmp.ge.s32.totalorder %s793_s21, 4   ;;  %s945_s9 = smov %s697_s10 }
 0x1d7   : > { %s946_s10 = smov %s701_s11  ;;  %s947_s11 = smov %s810_s29 }
 0x1d8   : > { %s948_s12 = smov %s793_s21  ;;  %18 = sbr.rel (!%p16_p13) target bundleno = 6 (0x6), region = 77 }
 0x1dd   :  { %425 = vsyncpa [#allocation4], 1 }
 0x1de   :  { %427 = vsyncpa [#allocation4 + $0x1], 1 }
 0x1df   :  { %428 = vsyncpa [#allocation7], 1 }
 0x1e0   :  { %429 = vsyncpa [#allocation5], 1 }
 0x1e1   :  { %431 = vsyncpa [#allocation5 + $0x1], 1 }

</bundles_post_ra>
